<compile_context>
chip_gen: v5e
topology: v5e:2x2
jax: 0.10.0
libtpu: 0.0.40
codegen_flags: <defaults>
</compile_context>

<pallas_src>
import jax
import jax.numpy as jnp
from jax.experimental import pallas as pl
from jax.experimental.pallas import tpu as pltpu

_H0, _H1, _NCLS = 100, 50, 10       # logical layer widths
_H0P, _H1P = 128, 128               # lane-padded hidden widths


def _round_up(n, m):
    return ((n + m - 1) // m) * m


# ----------------------------------------------------------------------------
# Kernel
# ----------------------------------------------------------------------------
def _firstnet_kernel(x_ref, w0_ref, b0_ref, w1_ref, b1_ref, w2_ref, b2_ref,
                     o_ref):
    # x_ref: (TILE_B, D) f32 ; w0: (D, 128) bf16 ; w1: (128, 128) bf16 ;
    # w2: (128, 10) bf16 ; biases f32 ; o_ref: (TILE_B, 10) f32
    x = x_ref[...].astype(jnp.bfloat16)        # cast on-chip; f32 streamed from HBM

    # fc0 + ReLU  (bf16 MXU, f32 accumulate, f32 elementwise)
    h0 = jnp.dot(x, w0_ref[...], preferred_element_type=jnp.float32)
    h0 = jnp.maximum(h0 + b0_ref[...], 0.0)

    # fc1 + ReLU
    h1 = jnp.dot(h0.astype(jnp.bfloat16), w1_ref[...],
                 preferred_element_type=jnp.float32)
    h1 = jnp.maximum(h1 + b1_ref[...], 0.0)

    # fc2 (10 real classes only; padded hidden units are exactly zero)
    logits = jnp.dot(h1.astype(jnp.bfloat16), w2_ref[...],
                     preferred_element_type=jnp.float32)
    logits = logits + b2_ref[...]

    # log_softmax over the class axis (numerically stable, f32)
    m = jnp.max(logits, axis=-1, keepdims=True)
    shifted = logits - m
    lse = jnp.log(jnp.sum(jnp.exp(shifted), axis=-1, keepdims=True))
    o_ref[...] = (shifted - lse).astype(o_ref.dtype)


# ----------------------------------------------------------------------------
# Params
# ----------------------------------------------------------------------------
def init_params(key, image_size):
    """fp32 master params matching nn.Linear shapes (stored as (in, out))."""
    ks = jax.random.split(key, 6)

    def linear(kw, kb, fan_in, fan_out):
        bound = 1.0 / jnp.sqrt(fan_in)
        w = jax.random.uniform(kw, (fan_in, fan_out), jnp.float32,
                               -bound, bound)
        b = jax.random.uniform(kb, (1, fan_out), jnp.float32, -bound, bound)
        return w, b

    w0, b0 = linear(ks[0], ks[1], image_size, _H0)
    w1, b1 = linear(ks[2], ks[3], _H0, _H1)
    w2, b2 = linear(ks[4], ks[5], _H1, _NCLS)
    return dict(w0=w0, b0=b0, w1=w1, b1=b1, w2=w2, b2=b2)


def prepare_kernel_params(p):
    """One-time prep: zero-pad hidden widths to 128, cast weights to bf16.

    Call this ONCE (outside the per-step forward path) and reuse the result.
    """
    bf = jnp.bfloat16

    def pad_cols(a, n):
        return jnp.pad(a, ((0, 0), (0, n - a.shape[1])))

    def pad_rows(a, n):
        return jnp.pad(a, ((0, n - a.shape[0]), (0, 0)))

    w0 = pad_cols(p["w0"].astype(bf), _H0P)                    # (D, 128)
    b0 = pad_cols(p["b0"], _H0P).astype(jnp.float32)           # (1, 128)
    w1 = pad_cols(pad_rows(p["w1"].astype(bf), _H0P), _H1P)    # (128, 128)
    b1 = pad_cols(p["b1"], _H1P).astype(jnp.float32)           # (1, 128)
    w2 = pad_rows(p["w2"].astype(bf), _H1P)                    # (128, 10)
    b2 = p["b2"].astype(jnp.float32)                           # (1, 10)
    return (w0, b0, w1, b1, w2, b2)


# ----------------------------------------------------------------------------
# Forward
# ----------------------------------------------------------------------------
def firstnet_forward(x, kparams, tile_b=2048):
    """x: (B, C, H, W) float32.  kparams: tuple from prepare_kernel_params."""
    w0, b0, w1, b1, w2, b2 = kparams
    D = w0.shape[0]

    xb = x.reshape(-1, D)                      # x.view(-1, image_size), stays f32
    B = xb.shape[0]

    # --- batch tile selection -------------------------------------------------
    # >=2 grid steps when the batch allows it (feeds both v7x TensorCores);
    # always a multiple of 8 sublanes.
    tb = min(_round_up(tile_b, 8), max(8, _round_up(pl.cdiv(B, 2), 8)))

    # VMEM budget: f32 x double-buffer + f32 out double-buffer + f32
    # intermediates (h0/h1/logits) + resident weights.  Keep well under the
    # v7x 64 MiB physical VMEM.
    w_bytes = sum(a.size * a.dtype.itemsize for a in (w0, b0, w1, b1, w2, b2)) * 2
    per_row = 2 * D * 4 + 2 * _NCLS * 4 + 3 * _H0P * 4
    budget = 40 * 1024 * 1024
    tb_cap = max(8, ((budget - w_bytes) // per_row) // 8 * 8)
    tb = int(min(tb, tb_cap))

    grid = (pl.cdiv(B, tb),)                   # ragged last block handled by Pallas

    vmem_limit = int(min(48 * 1024 * 1024,
                         max(32 * 1024 * 1024, int((tb * per_row + w_bytes) * 1.5))))

    # x / output tiled over batch; weights & biases resident (constant index_map).
    x_spec = pl.BlockSpec((tb, D), lambda i: (i, 0))
    o_spec = pl.BlockSpec((tb, _NCLS), lambda i: (i, 0))
    const = lambda a: pl.BlockSpec(a.shape, lambda i: (0, 0))

    flops = 2 * B * (D * _H0P + _H0P * _H1P + _H1P * _NCLS)
    bytes_accessed = (xb.size * 4                       # f32 x stream (no wrapper cast)
                      + sum(a.size * a.dtype.itemsize
                            for a in (w0, b0, w1, b1, w2, b2))
                      + B * _NCLS * 4)                  # f32 output
    cost = pl.CostEstimate(flops=flops,
                           transcendentals=B * (_NCLS + 1),   # exp + log
                           bytes_accessed=bytes_accessed)

    out = pl.pallas_call(
        _firstnet_kernel,
        out_shape=jax.ShapeDtypeStruct((B, _NCLS), jnp.float32),
        grid=grid,
        in_specs=[x_spec, const(w0), const(b0), const(w1), const(b1),
                  const(w2), const(b2)],
        out_specs=o_spec,
        compiler_params=pltpu.CompilerParams(
            dimension_semantics=("parallel",),
            vmem_limit_bytes=vmem_limit),
        cost_estimate=cost,
    )(xb, w0, b0, w1, b1, w2, b2)

    return out


# ----------------------------------------------------------------------------
# Reference (same bf16-matmul / f32-elementwise semantics as the kernel)
# ----------------------------------------------------------------------------
def _reference(x, p):
    bf = jnp.bfloat16
    xb = x.reshape(x.shape[0], -1).astype(bf)
    h0 = jnp.maximum(
        jnp.dot(xb, p["w0"].astype(bf), preferred_element_type=jnp.float32)
        + p["b0"], 0.0)
    h1 = jnp.maximum(
        jnp.dot(h0.astype(bf), p["w1"].astype(bf),
                preferred_element_type=jnp.float32) + p["b1"], 0.0)
    logits = jnp.dot(h1.astype(bf), p["w2"].astype(bf),
                     preferred_element_type=jnp.float32) + p["b2"]
    return jax.nn.log_softmax(logits, axis=1)


if __name__ == "__main__":
    key = jax.random.PRNGKey(0)
    k_x, k_p = jax.random.split(key)

    B, C, H, W = 8, 1, 16, 16              # image_size = C*H*W = 256
    image_size = C * H * W
    x = jax.random.normal(k_x, (B, C, H, W), jnp.float32)
    params = init_params(k_p, image_size)
    kparams = prepare_kernel_params(params)          # hoisted one-time prep

    fwd = jax.jit(firstnet_forward, static_argnames=("tile_b",))

    # Single-tile path (B=8 -> one grid step).
    out = jax.block_until_ready(fwd(x, kparams))
    ref = _reference(x, params)
    assert out.shape == (B, _NCLS)
    assert jnp.allclose(out, ref, atol=1e-4, rtol=1e-4)

    # Multi-step grid with a ragged last block (B=20, tile=8 -> grid=3, no pad).
    B2 = 20
    x2 = jax.random.normal(jax.random.PRNGKey(1), (B2, C, H, W), jnp.float32)
    out2 = jax.block_until_ready(fwd(x2, kparams, tile_b=8))
    ref2 = _reference(x2, params)
    assert out2.shape == (B2, _NCLS)
    assert jnp.allclose(out2, ref2, atol=1e-4, rtol=1e-4)

    print("KERNEL_OK")
</pallas_src>

<mosaic_0001>
module attributes {stable_mosaic.version = 11 : i64} {
  func.func @_firstnet_kernel(%arg0: i32, %arg1: memref<8x256xf32, #tpu.memory_space<vmem>>, %arg2: memref<256x128xbf16, #tpu.memory_space<vmem>>, %arg3: memref<1x128xf32, #tpu.memory_space<vmem>>, %arg4: memref<128x128xbf16, #tpu.memory_space<vmem>>, %arg5: memref<1x128xf32, #tpu.memory_space<vmem>>, %arg6: memref<128x10xbf16, #tpu.memory_space<vmem>>, %arg7: memref<1x10xf32, #tpu.memory_space<vmem>>, %arg8: memref<8x10xf32, #tpu.memory_space<vmem>>) attributes {dimension_semantics = [#tpu.dimension_semantics<parallel>], iteration_bounds = array<i64: 1>, scalar_prefetch = 0 : i64, scratch_operands = 0 : i64, tpu.core_type = #tpu.core_type<tc>, window_params = [{transform_indices = @transform_0, window_bounds = array<i64: 8, 256>}, {pipeline_mode = #tpu.pipeline_mode<synchronous>, transform_indices = @transform_1, window_bounds = array<i64: 256, 128>}, {pipeline_mode = #tpu.pipeline_mode<synchronous>, transform_indices = @transform_2, window_bounds = array<i64: 1, 128>}, {pipeline_mode = #tpu.pipeline_mode<synchronous>, transform_indices = @transform_3, window_bounds = array<i64: 128, 128>}, {pipeline_mode = #tpu.pipeline_mode<synchronous>, transform_indices = @transform_4, window_bounds = array<i64: 1, 128>}, {pipeline_mode = #tpu.pipeline_mode<synchronous>, transform_indices = @transform_5, window_bounds = array<i64: 128, 10>}, {pipeline_mode = #tpu.pipeline_mode<synchronous>, transform_indices = @transform_6, window_bounds = array<i64: 1, 10>}, {transform_indices = @transform_7, window_bounds = array<i64: 8, 10>}]} {
    %c0 = arith.constant 0 : index
    %c0_0 = arith.constant 0 : index
    %0 = vector.load %arg1[%c0, %c0_0] : memref<8x256xf32, #tpu.memory_space<vmem>>, vector<8x256xf32>
    %1 = arith.truncf %0 : vector<8x256xf32> to vector<8x256xbf16>
    %c0_1 = arith.constant 0 : index
    %c0_2 = arith.constant 0 : index
    %2 = vector.load %arg2[%c0_1, %c0_2] : memref<256x128xbf16, #tpu.memory_space<vmem>>, vector<256x128xbf16>
    %cst = arith.constant dense<0.000000e+00> : vector<8x128xf32>
    %3 = tpu.matmul %1, %2, %cst {dimension_numbers = #tpu.dot_dimension_numbers<[1], [0], [0], [1], [0, 0, 1, 1], [], []>} : vector<8x256xbf16>, vector<256x128xbf16>, vector<8x128xf32> -> vector<8x128xf32>
    %c0_3 = arith.constant 0 : index
    %c0_4 = arith.constant 0 : index
    %4 = vector.load %arg3[%c0_3, %c0_4] : memref<1x128xf32, #tpu.memory_space<vmem>>, vector<1x128xf32>
    %5 = vector.broadcast %4 : vector<1x128xf32> to vector<8x128xf32>
    %6 = arith.addf %3, %5 : vector<8x128xf32>
    %cst_5 = arith.constant 0.000000e+00 : f32
    %7 = vector.broadcast %cst_5 : f32 to vector<8x128xf32>
    %8 = arith.maximumf %6, %7 : vector<8x128xf32>
    %9 = arith.truncf %8 : vector<8x128xf32> to vector<8x128xbf16>
    %c0_6 = arith.constant 0 : index
    %c0_7 = arith.constant 0 : index
    %10 = vector.load %arg4[%c0_6, %c0_7] : memref<128x128xbf16, #tpu.memory_space<vmem>>, vector<128x128xbf16>
    %cst_8 = arith.constant dense<0.000000e+00> : vector<8x128xf32>
    %11 = tpu.matmul %9, %10, %cst_8 {dimension_numbers = #tpu.dot_dimension_numbers<[1], [0], [0], [1], [0, 0, 1, 1], [], []>} : vector<8x128xbf16>, vector<128x128xbf16>, vector<8x128xf32> -> vector<8x128xf32>
    %c0_9 = arith.constant 0 : index
    %c0_10 = arith.constant 0 : index
    %12 = vector.load %arg5[%c0_9, %c0_10] : memref<1x128xf32, #tpu.memory_space<vmem>>, vector<1x128xf32>
    %13 = vector.broadcast %12 : vector<1x128xf32> to vector<8x128xf32>
    %14 = arith.addf %11, %13 : vector<8x128xf32>
    %cst_11 = arith.constant 0.000000e+00 : f32
    %15 = vector.broadcast %cst_11 : f32 to vector<8x128xf32>
    %16 = arith.maximumf %14, %15 : vector<8x128xf32>
    %17 = arith.truncf %16 : vector<8x128xf32> to vector<8x128xbf16>
    %c0_12 = arith.constant 0 : index
    %c0_13 = arith.constant 0 : index
    %18 = vector.load %arg6[%c0_12, %c0_13] : memref<128x10xbf16, #tpu.memory_space<vmem>>, vector<128x10xbf16>
    %cst_14 = arith.constant dense<0.000000e+00> : vector<8x10xf32>
    %19 = tpu.matmul %17, %18, %cst_14 {dimension_numbers = #tpu.dot_dimension_numbers<[1], [0], [0], [1], [0, 0, 1, 1], [], []>} : vector<8x128xbf16>, vector<128x10xbf16>, vector<8x10xf32> -> vector<8x10xf32>
    %c0_15 = arith.constant 0 : index
    %c0_16 = arith.constant 0 : index
    %20 = vector.load %arg7[%c0_15, %c0_16] : memref<1x10xf32, #tpu.memory_space<vmem>>, vector<1x10xf32>
    %21 = vector.broadcast %20 : vector<1x10xf32> to vector<8x10xf32>
    %22 = arith.addf %19, %21 : vector<8x10xf32>
    %cst_17 = arith.constant dense<0xFF800000> : vector<8xf32>
    %23 = vector.multi_reduction <maximumf>, %22, %cst_17 [1] : vector<8x10xf32> to vector<8xf32>
    %24 = vector.shape_cast %23 : vector<8xf32> to vector<8x1xf32>
    %25 = vector.broadcast %24 : vector<8x1xf32> to vector<8x10xf32>
    %26 = arith.subf %22, %25 : vector<8x10xf32>
    %27 = math.exp %26 : vector<8x10xf32>
    %cst_18 = arith.constant dense<0.000000e+00> : vector<8xf32>
    %28 = vector.multi_reduction <add>, %27, %cst_18 [1] : vector<8x10xf32> to vector<8xf32>
    %29 = vector.shape_cast %28 : vector<8xf32> to vector<8x1xf32>
    %30 = math.log %29 : vector<8x1xf32>
    %31 = vector.broadcast %30 : vector<8x1xf32> to vector<8x10xf32>
    %32 = arith.subf %26, %31 : vector<8x10xf32>
    %c0_19 = arith.constant 0 : index
    %c0_20 = arith.constant 0 : index
    %33 = vector.load %arg8[%c0_19, %c0_20] : memref<8x10xf32, #tpu.memory_space<vmem>>, vector<8x10xf32>
    tpu.vector_store %arg8[%c0_19, %c0_20], %32 {strides = array<i32>} : memref<8x10xf32, #tpu.memory_space<vmem>>, vector<8x10xf32>,
    return
  }
  func.func @transform_0(%arg0: i32) -> (i32, i32) {
    %c0_i32 = arith.constant 0 : i32
    %c0_i32_0 = arith.constant 0 : i32
    return %arg0, %c0_i32 : i32, i32
  }
  func.func @transform_1(%arg0: i32) -> (i32, i32) {
    %c0_i32 = arith.constant 0 : i32
    %c0_i32_0 = arith.constant 0 : i32
    %c0_i32_1 = arith.constant 0 : i32
    return %c0_i32, %c0_i32_0 : i32, i32
  }
  func.func @transform_2(%arg0: i32) -> (i32, i32) {
    %c0_i32 = arith.constant 0 : i32
    %c0_i32_0 = arith.constant 0 : i32
    %c0_i32_1 = arith.constant 0 : i32
    return %c0_i32, %c0_i32_0 : i32, i32
  }
  func.func @transform_3(%arg0: i32) -> (i32, i32) {
    %c0_i32 = arith.constant 0 : i32
    %c0_i32_0 = arith.constant 0 : i32
    %c0_i32_1 = arith.constant 0 : i32
    return %c0_i32, %c0_i32_0 : i32, i32
  }
  func.func @transform_4(%arg0: i32) -> (i32, i32) {
    %c0_i32 = arith.constant 0 : i32
    %c0_i32_0 = arith.constant 0 : i32
    %c0_i32_1 = arith.constant 0 : i32
    return %c0_i32, %c0_i32_0 : i32, i32
  }
  func.func @transform_5(%arg0: i32) -> (i32, i32) {
    %c0_i32 = arith.constant 0 : i32
    %c0_i32_0 = arith.constant 0 : i32
    %c0_i32_1 = arith.constant 0 : i32
    return %c0_i32, %c0_i32_0 : i32, i32
  }
  func.func @transform_6(%arg0: i32) -> (i32, i32) {
    %c0_i32 = arith.constant 0 : i32
    %c0_i32_0 = arith.constant 0 : i32
    %c0_i32_1 = arith.constant 0 : i32
    return %c0_i32, %c0_i32_0 : i32, i32
  }
  func.func @transform_7(%arg0: i32) -> (i32, i32) {
    %c0_i32 = arith.constant 0 : i32
    %c0_i32_0 = arith.constant 0 : i32
    return %arg0, %c0_i32 : i32, i32
  }
}

</mosaic_0001>

<bundles_post_ra>
// kernel: firstnet_forward.1
= control target key start
LH: loop header
LB: loop body
LE: loop exit
PB: predicated region body
PF: predicated region fallthrough
CT: control target
= control target key end

     0   :  { %s737_s0 = inlined_call_operand.vmem [shape: f32[8,256], index: 0, kind: input, shape index: {}]   ;;  %s738_s1 = inlined_call_operand.vmem [shape: bf16[256,128], index: 1, kind: input, shape index: {}]   ;;  %s739_s2 = inlined_call_operand.vmem [shape: f32[1,128], index: 2, kind: input, shape index: {}]   ;;  %s740_s3 = inlined_call_operand.vmem [shape: bf16[128,128], index: 3, kind: input, shape index: {}]   ;;  %s741_s4 = inlined_call_operand.vmem [shape: f32[1,128], index: 4, kind: input, shape index: {}]   ;;  %s742_s5 = inlined_call_operand.vmem [shape: bf16[128,10], index: 5, kind: input, shape index: {}]   ;;  %s743_s6 = inlined_call_operand.vmem [shape: f32[1,10], index: 6, kind: input, shape index: {}]   ;;  %s744_s7 = inlined_call_operand.hbm [shape: f32[8,10], index: 7, kind: output, shape index: {}]  }
   0x1   :  { %v520_v0 = vld [vmem:[%s738_s1 + $0x38] sm:$0xff]  ;;  %v519_v2 = vld [vmem:[%s738_s1 + $0x30] sm:$0xff]  ;;  %v518_v4 = vld [vmem:[%s738_s1 + $0x28] sm:$0xff] }
   0x2   :  { %v528_v1 = vld [vmem:[%s738_s1 + $0x78] sm:$0xff]  ;;  %163 = vmatpush.bf16.msra.mxu0 %v520_v0  ;;  %v527_v3 = vld [vmem:[%s738_s1 + $0x70] sm:$0xff]  ;;  %v526_v5 = vld [vmem:[%s738_s1 + $0x68] sm:$0xff] }
   0x3   :  { %176 = vmatpush.bf16.msra.mxu1 %v528_v1  ;;  %v536_v6 = vld [vmem:[%s740_s3 + $0x38] sm:$0xff]  ;;  %v535_v7 = vld [vmem:[%s740_s3 + $0x30] sm:$0xff] }
   0x4   :  { %259 = vmatpush.bf16.msra.mxu2 %v536_v6 }
   0x6   :  { %164 = vmatpush.bf16.msra.mxu0 %v519_v2 }
   0x7   :  { %177 = vmatpush.bf16.msra.mxu1 %v527_v3 }
   0x8   :  { %12 = vsyncpa [#allocation3], 0  ;;  %v517_v8 = vld [vmem:[%s738_s1 + $0x20] sm:$0xff]  ;;  %260 = vmatpush.bf16.msra.mxu2 %v535_v7  ;;  %v534_v10 = vld [vmem:[%s740_s3 + $0x28] sm:$0xff]  ;;  %vm355_vm0 = vcmask 80896   ;;  %s376_s26 = sshll.u32 %s744_s7, 4  ;;  %s377_s26 = int_to_ptr.hbm [resolvable:$true] %s376_s26 }
   0x9   :  { %v525_v9 = vld [vmem:[%s738_s1 + $0x60] sm:$0xff]  ;;  %v516_v11 = vld [vmem:[%s738_s1 + $0x18] sm:$0xff]  ;;  %v515_v14 = vld [vmem:[%s738_s1 + $0x10] sm:$0xff] }
   0xa   :  { %165 = vmatpush.bf16.msra.mxu0 %v518_v4  ;;  %v524_v12 = vld [vmem:[%s738_s1 + $0x58] sm:$0xff]  ;;  %v533_v13 = vld [vmem:[%s740_s3 + $0x20] sm:$0xff]  ;;  %v523_v15 = vld [vmem:[%s738_s1 + $0x50] sm:$0xff] }
   0xb   :  { %178 = vmatpush.bf16.msra.mxu1 %v526_v5  ;;  %v532_v16 = vld [vmem:[%s740_s3 + $0x18] sm:$0xff]  ;;  %v514_v17 = vld [vmem:[%s738_s1 + $0x8] sm:$0xff]  ;;  %v531_v19 = vld [vmem:[%s740_s3 + $0x10] sm:$0xff] }
   0xc   :  { %261 = vmatpush.bf16.msra.mxu2 %v534_v10  ;;  %v522_v18 = vld [vmem:[%s738_s1 + $0x48] sm:$0xff]  ;;  %v513_v20 = vld [vmem:[%s738_s1] sm:$0xff]  ;;  %v544_v28 = vld [vmem:[%s742_s5 + $0x38] sm:$0xff] }
   0xd   :  { %v521_v21 = vld [vmem:[%s738_s1 + $0x40] sm:$0xff]  ;;  %v28_v23 = vld [vmem:[%s737_s0 + $0x8] sm:$0xff]  ;;  %342 = vmatpush.bf16.msra.mxu3 %v544_v28  ;;  %v543_v29 = vld [vmem:[%s742_s5 + $0x30] sm:$0xff] }
   0xe   :  { %166 = vmatpush.bf16.msra.mxu0 %v517_v8  ;;  %v27_v22 = vld [vmem:[%s737_s0] sm:$0xff]  ;;  %v30_v25 = vpack.c.bf16 %v28_v23, %v28_v23  ;;  %v530_v26 = vld [vmem:[%s740_s3 + $0x8] sm:$0xff]  ;;  %v540_v32 = vld [vmem:[%s742_s5 + $0x18] sm:$0xff] }
   0xf   :  { %179 = vmatpush.bf16.msra.mxu1 %v525_v9  ;;  %v29_v24 = vpack.c.bf16 %v27_v22, %v27_v22  ;;  %v529_v27 = vld [vmem:[%s740_s3] sm:$0xff]  ;;  %v542_v30 = vld [vmem:[%s742_s5 + $0x28] sm:$0xff]  ;;  %v539_v33 = vld [vmem:[%s742_s5 + $0x10] sm:$0xff] }
  0x10   :  { %262 = vmatpush.bf16.msra.mxu2 %v533_v13  ;;  %v541_v31 = vld [vmem:[%s742_s5 + $0x20] sm:$0xff]  ;;  %v538_v43 = vld [vmem:[%s742_s5 + $0x8] sm:$0xff] }
  0x11   :  { %343 = vmatpush.bf16.msra.mxu3 %v543_v29  ;;  %v546_v34 = vld [vmem:[%s739_s2] ss:$0 sm:$0xff] }
  0x12   :  { %167 = vmatpush.bf16.msra.mxu0 %v516_v11  ;;  %v537_v44 = vld [vmem:[%s742_s5] sm:$0xff] }
  0x13   :  { %180 = vmatpush.bf16.msra.mxu1 %v524_v12  ;;  %v547_v45 = vld [vmem:[%s741_s4] ss:$0 sm:$0xff]  ;;  %s579_s4 = smov [#allocation2]  }
  0x14   :  { %263 = vmatpush.bf16.msra.mxu2 %v532_v16  ;;  %v548_v51 = vld [vmem:[%s743_s6] ss:$0 sm:$0xff]  ;;  %s374_s5 = sshll.u32 %s579_s4, 4  ;;  %s375_s5 = int_to_ptr.vmem [resolvable:$true] %s374_s5 }
  0x15   :  { %344 = vmatpush.bf16.msra.mxu3 %v542_v30 }
  0x16   :  { %168 = vmatpush.bf16.msra.mxu0 %v515_v14 }
  0x17   :  { %181 = vmatpush.bf16.msra.mxu1 %v523_v15 }
  0x18   :  { %264 = vmatpush.bf16.msra.mxu2 %v531_v19 }
  0x19   :  { %345 = vmatpush.bf16.msra.mxu3 %v541_v31 }
  0x1a   :  { %169 = vmatpush.bf16.msra.mxu0 %v514_v17 }
  0x1b   :  { %182 = vmatpush.bf16.msra.mxu1 %v522_v18 }
  0x1c   :  { %265 = vmatpush.bf16.msra.mxu2 %v530_v26 }
  0x1d   :  { %346 = vmatpush.bf16.msra.mxu3 %v540_v32 }
  0x1e   :  { %170 = vmatpush.bf16.msra.mxu0 %v513_v20 }
  0x1f   :  { %183 = vmatpush.bf16.msra.mxu1 %v521_v21 }
  0x20   :  { %266 = vmatpush.bf16.msra.mxu2 %v529_v27 }
  0x21   :  { %171 = vmatmul.bf16.vlgmr.msra.gmra.mxu0 %v29_v24  ;;  %347 = vmatpush.bf16.msra.mxu3 %v539_v33 }
  0x22   :  { %184 = vmatmul.bf16.vlgmr.msra.gmra.mxu1 %v30_v25 }
  0x25   :  { %348 = vmatpush.bf16.msra.mxu3 %v538_v43 }
  0x29   :  { %349 = vmatpush.bf16.msra.mxu3 %v537_v44 }
  0x9e   :  { %v172_v35 = vpop.f32.mrf.mxu0 }
  0x9f   :  { %v185_v36 = vpop.f32.mrf.mxu1  ;;  %v173_v37 = vadd.f32 %v546_v34, %v172_v35 }
  0xa1   :  { %v186_v38 = vadd.f32 %v185_v36, %v173_v37 }
  0xa3   :  { %v189_v39 = vmax.f32 %v186_v38, 0.0 }
  0xa5   :  { %v190_v40 = vpack.c.bf16 %v189_v39, %v189_v39 }
  0xa6   :  { %v174_v41 = vpop.f32.mrf.mxu0 }
  0xa7   :  { %v187_v42 = vpop.f32.mrf.mxu1  ;;  %267 = vmatmul.bf16.vlgmr.msra.gmra.mxu2 %v190_v40 }
 0x12a   :  { %v268_v46 = vpop.f32.mrf.mxu2 }
 0x12b   :  { %v269_v47 = vadd.f32 %v547_v45, %v268_v46 }
 0x12d   :  { %v272_v48 = vmax.f32 %v269_v47, 0.0 }
 0x12f   :  { %v273_v49 = vpack.c.bf16 %v272_v48, %v272_v48 }
 0x131   :  { %350 = vmatmul.bf16.vlgmr.msra.gmra.mxu3 %v273_v49 }
 0x132   :  { %v270_v50 = vpop.f32.mrf.mxu2 }
 0x1b4   :  { %v351_v52 = vpop.f32.mrf.mxu3 }
 0x1b5   :  { %v352_v53 = vadd.f32 %v548_v51, %v351_v52 }
 0x1b7   :  { %v356_v54 = vsel %vm355_vm0, %v352_v53, -inf }
 0x1b8   :  { %357 = vmax.xlane.f32.xlu0 %v356_v54 }
 0x1bc   :  { %v353_v55 = vpop.f32.mrf.mxu3 }
 0x22b   :  { %v358_v56 = vpop.xlane.xlu0 %357 }
 0x22c   :  { %v359_v57 = vsub.f32 %v352_v53, %v358_v56 }
 0x22e   :  { %v360_v58 = vmul.f32 1.442695, %v359_v57 }
 0x230   :  { %549 = vpow2.f32 %v360_v58 }
 0x236   :  { %v550_v59 = vpop.eup %549 }
 0x237   :  { %v362_v60 = vsel %vm355_vm0, %v550_v59, 0.0 }
 0x238   :  { %363 = vadd.xlane.f32.xlu0 %v362_v60 }
 0x2ab   :  { %v364_v61 = vpop.xlane.xlu0 %363 }
 0x2ac   :  { %551 = vlog2.f32 %v364_v61 }
 0x2b2   :  { %v552_v62 = vpop.eup %551 }
 0x2b3   :  { %v366_v63 = vmul.f32 0.6931472, %v552_v62 }
 0x2b5   :  { %v367_v0 = vsub.f32 %v359_v57, %v366_v63 }
 0x2b7   :  { %368 = vst.msk [vmem:[#allocation2] sm:$0xff] %vm355_vm0, %v367_v0 }
 0x2b8   :  { %379 = dma.vmem_to_hbm [thread:$0]  %s375_s5, 128, %s377_s26, [#allocation3]  }
 0x2b9   :  { %577 = dma.done.wait [#allocation3], 128  }
 0x2ba   :  { %578 = vsyncadd [#allocation3], 4294967168 }
 0x2bb   :  { %384 = vsyncpa [#allocation3], 1 }

</bundles_post_ra>
